<compile_context>
chip_gen: v7x
topology: tpu7x:2x2x1
jax: 0.10.0
libtpu: 0.0.40
codegen_flags: <defaults>
</compile_context>

<pallas_src>
import math

import jax
import jax.numpy as jnp
from jax.experimental import pallas as pl
from jax.experimental.pallas import tpu as pltpu


def _copy_kernel(x_ref, o_ref):
    # Straight copy of the current VMEM tile (lane-dense, unmasked vst).
    o_ref[...] = x_ref[...]


@jax.jit
def printlayer_forward(x):
    """Identity forward matching printlayer.forward (returns x unchanged)."""
    orig_shape = x.shape
    total = math.prod(orig_shape)
    itemsize = jnp.dtype(x.dtype).itemsize

    # Pick a lane-dense last dimension (prefer long unmasked vst runs).
    if total % 1024 == 0:
        cols = 1024
    else:
        cols = 128

    # Pad the flat array up to a multiple of `cols` if needed (lane-dense slab),
    # slice the padding back off after the kernel.
    padded_total = pl.cdiv(total, cols) * cols
    flat = x.reshape(total)
    if padded_total != total:
        flat = jnp.pad(flat, (0, padded_total - total))
    rows = padded_total // cols
    x2d = flat.reshape(rows, cols)

    # Row tile targeting ~2 MiB per tile (×2 in + ×2 out double buffers = ~8 MiB,
    # safe under v5e's 16 MiB default scoped VMEM and v7x's 64 MiB physical VMEM).
    target_tile_bytes = 2 * 1024 * 1024
    tile_r = max(8, (target_tile_bytes // (cols * itemsize)) // 8 * 8)
    if tile_r >= rows:
        tile_r = rows  # block == full row extent, single grid step
    grid_r = pl.cdiv(rows, tile_r)

    y2d = pl.pallas_call(
        _copy_kernel,
        out_shape=jax.ShapeDtypeStruct((rows, cols), x.dtype),
        grid_spec=pltpu.PrefetchScalarGridSpec(
            num_scalar_prefetch=0,
            grid=(grid_r,),
            in_specs=[pl.BlockSpec((tile_r, cols), lambda i: (i, 0))],
            out_specs=pl.BlockSpec((tile_r, cols), lambda i: (i, 0)),
        ),
        compiler_params=pltpu.CompilerParams(
            dimension_semantics=("parallel",),
        ),
        input_output_aliases={0: 0},
        cost_estimate=pl.CostEstimate(
            flops=0,
            transcendentals=0,
            bytes_accessed=2 * padded_total * itemsize,
        ),
    )(x2d)

    y_flat = y2d.reshape(padded_total)
    if padded_total != total:
        y_flat = y_flat[:total]
    return y_flat.reshape(orig_shape)


if __name__ == "__main__":
    key = jax.random.PRNGKey(0)
    # Small NCHW input consistent with a CIFAR-style feature map.
    x = jax.random.normal(key, (2, 4, 16, 16), dtype=jnp.float32)

    y = printlayer_forward(x)
    y = jax.block_until_ready(y)

    assert y.shape == x.shape
    assert y.dtype == x.dtype
    assert bool(jnp.array_equal(y, x))

    print("KERNEL_OK")
</pallas_src>

<mosaic_0001>
module attributes {stable_mosaic.version = 11 : i64} {
  func.func @_copy_kernel(%arg0: i32, %arg1: memref<2x1024xf32, #tpu.memory_space<vmem>>, %arg2: memref<2x1024xf32, #tpu.memory_space<vmem>>) attributes {dimension_semantics = [#tpu.dimension_semantics<parallel>], iteration_bounds = array<i64: 1>, scalar_prefetch = 0 : i64, scratch_operands = 0 : i64, tpu.core_type = #tpu.core_type<tc>, window_params = [{transform_indices = @transform_0, window_bounds = array<i64: 2, 1024>}, {transform_indices = @transform_1, window_bounds = array<i64: 2, 1024>}]} {
    %c0 = arith.constant 0 : index
    %c0_0 = arith.constant 0 : index
    %0 = vector.load %arg1[%c0, %c0_0] : memref<2x1024xf32, #tpu.memory_space<vmem>>, vector<2x1024xf32>
    %c0_1 = arith.constant 0 : index
    %c0_2 = arith.constant 0 : index
    %1 = vector.load %arg2[%c0_1, %c0_2] : memref<2x1024xf32, #tpu.memory_space<vmem>>, vector<2x1024xf32>
    tpu.vector_store %arg2[%c0_1, %c0_2], %0 {strides = array<i32>} : memref<2x1024xf32, #tpu.memory_space<vmem>>, vector<2x1024xf32>,
    return
  }
  func.func @transform_0(%arg0: i32) -> (i32, i32) {
    %c0_i32 = arith.constant 0 : i32
    %c0_i32_0 = arith.constant 0 : i32
    return %arg0, %c0_i32 : i32, i32
  }
  func.func @transform_1(%arg0: i32) -> (i32, i32) {
    %c0_i32 = arith.constant 0 : i32
    %c0_i32_0 = arith.constant 0 : i32
    return %arg0, %c0_i32 : i32, i32
  }
}

</mosaic_0001>

<bundles_post_ra>
// kernel: printlayer_forward.1
= control target key start
LH: loop header
LB: loop body
LE: loop exit
PB: predicated region body
PF: predicated region fallthrough
CT: control target
= control target key end

     0   :  { %s38_s0 = inlined_call_operand.vmem [shape: f32[2,1024], index: 0, kind: input, shape index: {}, may-alias: {0,1}]   ;;  %s39_s1 = inlined_call_operand.vmem [shape: f32[2,1024], index: 1, kind: output, shape index: {}, may-alias: {0,1}]  }
   0x1   :  { %v8_v0 = vld [vmem:[%s38_s0] sm:$0xff]  ;;  %v9_v1 = vld [vmem:[%s38_s0 + $0x8] sm:$0xff] }
   0x2   :  { %10 = vst [vmem:[%s39_s1] sm:$0xff] %v8_v0  ;;  %11 = vst [vmem:[%s39_s1 + $0x8] sm:$0xff] %v9_v1 }

</bundles_post_ra>
